<compile_context>
chip_gen: v5e
topology: v5e:2x2
jax: 0.10.0
libtpu: 0.0.40
codegen_flags: <defaults>
</compile_context>

<pallas_src>
from functools import partial

import numpy as np
import jax
import jax.numpy as jnp
from jax import lax
from jax.experimental import pallas as pl
from jax.experimental.pallas import tpu as pltpu

GRID = 16                  # grid_size (small stand-in for 100)
FEAT = 32                  # feature_dim (small stand-in for 256)
CIN, C1, C2 = 2, 16, 32    # conv channel widths from the module


# ----------------------------------------------------------------------------
# Pallas kernel: fused affine pipeline (the only runtime compute)
# ----------------------------------------------------------------------------
def affine_kernel(x_ref, w_ref, b_ref, o_ref):
    """One K-slice of  out = x @ W_eff + b_eff  (f32 accumulate in o_ref).

    x_ref : (TN, TK)  f32   activations (flattened binary maps)
    w_ref : (TK, FP)  bf16  folded weight K-tile (FP = FEAT padded to 128)
    b_ref : (1,  FP)  f32   folded bias
    o_ref : (TN, FP)  f32   resident output / accumulator block
    """
    @pl.when(pl.program_id(1) == 0)
    def _():
        o_ref[...] = jnp.zeros_like(o_ref) + b_ref[...]        # init with bias
    o_ref[...] += jnp.dot(x_ref[...].astype(jnp.bfloat16), w_ref[...],
                          preferred_element_type=jnp.float32)


# ----------------------------------------------------------------------------
# Tiling helpers
# ----------------------------------------------------------------------------
def _round_up(x, m):
    return -(-x // m) * m


def _pick_k_tiling(D, FP, tn_bound=256):
    """Lane-aligned, VMEM-aware K tile.

    Budget ~10 MB keeps the double-buffered bf16 weight tile + f32 activation
    tile under every chip's default scoped-VMEM limit (v5e 16 MiB is the
    smallest), so no vmem_limit override is required.
    """
    budget = 10 << 20
    bytes_per_k = 2 * (FP * 2 + tn_bound * 4)       # 2x double buffering
    tk_cap = max(128, (budget // bytes_per_k) // 128 * 128)
    if D <= tk_cap:
        tk = _round_up(D, 128)
    else:
        ksteps = -(-D // tk_cap)
        tk = _round_up(-(-D // ksteps), 128)
    d_pad = _round_up(D, tk)
    return tk, d_pad


# ----------------------------------------------------------------------------
# Pure-JAX reference (also used to fold the affine pipeline at init)
# ----------------------------------------------------------------------------
def _conv_conv_linear(x, params):
    """x: (N, CIN, H, W) -> (N, FEAT).  Matches Conv2d x2 + Linear (no act)."""
    y = lax.conv_general_dilated(x, params["w1"], (1, 1), [(1, 1), (1, 1)],
                                 dimension_numbers=("NCHW", "OIHW", "NCHW"),
                                 precision=lax.Precision.HIGHEST)
    y = y + params["b1"][None, :, None, None]
    y = lax.conv_general_dilated(y, params["w2"], (1, 1), [(1, 1), (1, 1)],
                                 dimension_numbers=("NCHW", "OIHW", "NCHW"),
                                 precision=lax.Precision.HIGHEST)
    y = y + params["b2"][None, :, None, None]
    flat = y.reshape(x.shape[0], -1)                 # NCHW flatten (torch order)
    return (jnp.dot(flat, params["wp"].T, precision=lax.Precision.HIGHEST)
            + params["bp"][None, :])


def reference_forward(binary_maps, params):
    B, K, cin, H, W = binary_maps.shape
    out = _conv_conv_linear(binary_maps.reshape(B * K, cin, H, W), params)
    return out.reshape(B, K, -1)


# ----------------------------------------------------------------------------
# One-time parameter preparation: fold conv∘conv∘linear into (W_eff, b_eff)
# ----------------------------------------------------------------------------
def prepare_kernel_params(params, cin, H, W, feat):
    def fwd_single(x_img):                           # (cin, H, W) -> (feat,)
        return _conv_conv_linear(x_img[None], params)[0]

    x0 = jnp.zeros((cin, H, W), jnp.float32)
    b_eff = fwd_single(x0)                           # bias of the affine map
    # Exact Jacobian of a linear map: `feat` VJPs, done once at init.
    w_eff = jax.jacrev(fwd_single)(x0)               # (feat, cin, H, W)
    D = cin * H * W
    w_eff = w_eff.reshape(feat, D).T                 # (D, feat), NCHW row order

    # Lane-pad FEAT to a multiple of 128 -> unmasked (lane-dense) output stores.
    fp = _round_up(feat, 128)
    tk, d_pad = _pick_k_tiling(D, fp)
    w_pad = jnp.zeros((d_pad, fp), jnp.float32).at[:D, :feat].set(w_eff)
    b_pad = jnp.zeros((1, fp), jnp.float32).at[0, :feat].set(b_eff)
    kparams = dict(w_eff=w_pad.astype(jnp.bfloat16),  # bf16 stream, f32 acc
                   b_eff=b_pad)
    return kparams, tk


# ----------------------------------------------------------------------------
# Pallas wrapper
# ----------------------------------------------------------------------------
@partial(jax.jit, static_argnames=("feat", "tk"))
def pallas_affine_forward(binary_maps, w_eff, b_eff, *, feat, tk):
    # binary_maps: (B, K, CIN, H, W) float32
    B, K, cin, H, W = binary_maps.shape
    N, D = B * K, cin * H * W
    d_pad, fp = w_eff.shape
    x = binary_maps.reshape(N, D)                    # free reshape (NCHW order)

    # N tiling: full N when small, otherwise 128-row tiles.
    if N <= 256:
        tn, n_pad = N, N
    else:
        tn = 128
        n_pad = _round_up(N, tn)

    # Zero-pad activations to the padded (K-tileable) shape; padded K columns
    # hit zero weight rows, padded N rows only ever see the bias (sliced off).
    if (n_pad, d_pad) != (N, D):
        x = jnp.pad(x, ((0, n_pad - N), (0, d_pad - D)))

    out = pl.pallas_call(
        affine_kernel,
        out_shape=jax.ShapeDtypeStruct((n_pad, fp), jnp.float32),
        grid_spec=pltpu.PrefetchScalarGridSpec(
            num_scalar_prefetch=0,
            grid=(n_pad // tn, d_pad // tk),         # reduction axis last
            in_specs=[
                pl.BlockSpec((tn, tk), lambda n, k: (n, k)),
                pl.BlockSpec((tk, fp), lambda n, k: (k, 0)),
                pl.BlockSpec((1, fp), lambda n, k: (0, 0)),
            ],
            out_specs=pl.BlockSpec((tn, fp), lambda n, k: (n, 0)),
        ),
        compiler_params=pltpu.CompilerParams(
            dimension_semantics=("parallel", "arbitrary")),
    )(x, w_eff, b_eff)

    return out[:N, :feat].reshape(B, K, feat)


# ----------------------------------------------------------------------------
# Module (parameters + host-side binary-map generation glue)
# ----------------------------------------------------------------------------
class SpatialFeatureGeneratorPallas:
    def __init__(self, OA_distn, grid_size=GRID, feature_dim=FEAT, seed=0):
        self.OA_distn = OA_distn
        self.grid_size = grid_size
        self.feature_dim = feature_dim
        self._rng = np.random.default_rng(seed)
        ks = jax.random.split(jax.random.PRNGKey(seed), 6)
        g2 = grid_size * grid_size
        self.params = dict(
            w1=0.05 * jax.random.normal(ks[0], (C1, CIN, 3, 3), jnp.float32),
            b1=0.05 * jax.random.normal(ks[1], (C1,), jnp.float32),
            w2=0.05 * jax.random.normal(ks[2], (C2, CIN * 0 + C1, 3, 3), jnp.float32),
            b2=0.05 * jax.random.normal(ks[3], (C2,), jnp.float32),
            wp=0.02 * jax.random.normal(ks[4], (feature_dim, C2 * g2), jnp.float32),
            bp=0.02 * jax.random.normal(ks[5], (feature_dim,), jnp.float32),
        )
        # Fold conv∘conv∘linear (no nonlinearity in the nn.Sequential) once.
        self.kparams, self.k_tile = prepare_kernel_params(
            self.params, CIN, grid_size, grid_size, feature_dim)

    # --- glue: stochastic binary-map generation (host, like the torch code) ---
    def _sample_from_distribution(self, oid):
        d = self.OA_distn[oid]
        dx, dy = d["mean_xy"] + np.linalg.cholesky(d["cov_xy"]) @ self._rng.standard_normal(2)
        dw, dh = d["mean_wh"] + np.linalg.cholesky(d["cov_wh"]) @ self._rng.standard_normal(2)
        return dx, dy, dw, dh

    def generate_binary_map(self, ids):
        # TODO(synk): host/numpy glue (data-dependent canvas size + python
        # rasterisation loops, mirroring the torch module incl. its negative-
        # index slicing behaviour); no clean Pallas equivalent.
        B, K = ids.shape
        human_w = human_h = 100
        dx = np.zeros((B, K)); dy = np.zeros((B, K))
        dw = np.zeros((B, K)); dh = np.zeros((B, K))
        for b in range(B):
            for k in range(K):
                dx[b, k], dy[b, k], dw[b, k], dh[b, k] = \
                    self._sample_from_distribution(int(ids[b, k]))
        obj_x = (dx * human_w).astype(np.int32)
        obj_y = (dy * human_h).astype(np.int32)
        obj_w = (human_w * np.exp(dw)).astype(np.int32)
        obj_h = (human_h * np.exp(dh)).astype(np.int32)
        gx1 = np.minimum(0, obj_x); gy1 = np.minimum(0, obj_y)
        gx2 = np.maximum(human_w, obj_x + obj_w)
        gy2 = np.maximum(human_h, obj_y + obj_h)
        gW = int((gx2 - gx1).max()); gH = int((gy2 - gy1).max())
        human_maps = np.zeros((B, K, gH, gW), np.float32)
        obj_maps = np.zeros((B, K, gH, gW), np.float32)
        for b in range(B):
            for k in range(K):
                human_maps[b, k, :human_h, :human_w] = 1.0
                obj_maps[b, k, obj_y[b, k]:obj_y[b, k] + obj_h[b, k],
                               obj_x[b, k]:obj_x[b, k] + obj_w[b, k]] = 1.0
        maps = np.stack((human_maps, obj_maps), axis=2).reshape(-1, 2, gH, gW)
        # bilinear, align_corners=False equivalent
        scaled = jax.image.resize(jnp.asarray(maps),
                                  (B * K, 2, self.grid_size, self.grid_size),
                                  method="bilinear", antialias=False)
        return scaled.reshape(B, K, 2, self.grid_size, self.grid_size)

    def forward(self, OA_ids):
        maps = self.generate_binary_map(np.asarray(OA_ids))
        return pallas_affine_forward(jnp.asarray(maps, jnp.float32),
                                     self.kparams["w_eff"],
                                     self.kparams["b_eff"],
                                     feat=self.feature_dim, tk=self.k_tile)


def make_oa_distn(num_labels, rng):
    distn = []
    for _ in range(num_labels):
        a1 = rng.uniform(0.01, 0.05, size=(2, 2))
        a2 = rng.uniform(0.01, 0.05, size=(2, 2))
        distn.append(dict(
            mean_xy=rng.uniform(0.1, 0.5, size=2),
            cov_xy=a1 @ a1.T + 1e-3 * np.eye(2),
            mean_wh=rng.uniform(-0.2, 0.3, size=2),
            cov_wh=a2 @ a2.T + 1e-3 * np.eye(2),
        ))
    return distn


if __name__ == "__main__":
    B, K, NUM_LABELS = 2, 2, 6
    host_rng = np.random.default_rng(0)
    OA_distn = make_oa_distn(NUM_LABELS, host_rng)

    model = SpatialFeatureGeneratorPallas(OA_distn, grid_size=GRID,
                                          feature_dim=FEAT, seed=0)
    ids = jax.random.randint(jax.random.PRNGKey(0), (B, K), 0, NUM_LABELS)

    out = model.forward(ids)
    out = jax.block_until_ready(out)
    assert out.shape == (B, K, FEAT), out.shape

    # Correctness: Pallas folded-affine kernel vs. f32 conv∘conv∘linear
    # reference on the same binary maps.  The kernel streams the folded weight
    # in bf16 (f32 accumulation) -> 2e-2 tolerance.
    maps = model.generate_binary_map(np.asarray(ids))
    out2 = jax.block_until_ready(
        pallas_affine_forward(jnp.asarray(maps, jnp.float32),
                              model.kparams["w_eff"], model.kparams["b_eff"],
                              feat=FEAT, tk=model.k_tile))
    ref = reference_forward(jnp.asarray(maps, jnp.float32), model.params)
    np.testing.assert_allclose(np.asarray(out2), np.asarray(ref),
                               rtol=2e-2, atol=2e-2)

    print("KERNEL_OK")
</pallas_src>

<mosaic_0001>
module attributes {stable_mosaic.version = 11 : i64} {
  func.func @affine_kernel(%arg0: i32, %arg1: i32, %arg2: memref<4x512xf32, #tpu.memory_space<vmem>>, %arg3: memref<512x128xbf16, #tpu.memory_space<vmem>>, %arg4: memref<1x128xf32, #tpu.memory_space<vmem>>, %arg5: memref<4x128xf32, #tpu.memory_space<vmem>>) attributes {dimension_semantics = [#tpu.dimension_semantics<parallel>, #tpu.dimension_semantics<arbitrary>], iteration_bounds = array<i64: 1, 1>, scalar_prefetch = 0 : i64, scratch_operands = 0 : i64, tpu.core_type = #tpu.core_type<tc>, window_params = [{transform_indices = @transform_0, window_bounds = array<i64: 4, 512>}, {transform_indices = @transform_1, window_bounds = array<i64: 512, 128>}, {pipeline_mode = #tpu.pipeline_mode<synchronous>, transform_indices = @transform_2, window_bounds = array<i64: 1, 128>}, {transform_indices = @transform_3, window_bounds = array<i64: 4, 128>}]} {
    %c0_i32 = arith.constant 0 : i32
    %0 = arith.cmpi eq, %arg1, %c0_i32 : i32
    %1 = arith.extui %0 : i1 to i32
    %c0_i32_0 = arith.constant 0 : i32
    %2 = arith.cmpi ne, %1, %c0_i32_0 : i32
    scf.if %2 {
      %cst_8 = arith.constant 0.000000e+00 : f32
      %10 = vector.broadcast %cst_8 : f32 to vector<4x128xf32>
      %c0_9 = arith.constant 0 : index
      %c0_10 = arith.constant 0 : index
      %11 = vector.load %arg4[%c0_9, %c0_10] : memref<1x128xf32, #tpu.memory_space<vmem>>, vector<1x128xf32>
      %12 = vector.broadcast %11 : vector<1x128xf32> to vector<4x128xf32>
      %13 = arith.addf %10, %12 : vector<4x128xf32>
      %c0_11 = arith.constant 0 : index
      %c0_12 = arith.constant 0 : index
      %14 = vector.load %arg5[%c0_11, %c0_12] : memref<4x128xf32, #tpu.memory_space<vmem>>, vector<4x128xf32>
      tpu.vector_store %arg5[%c0_11, %c0_12], %13 {strides = array<i32>} : memref<4x128xf32, #tpu.memory_space<vmem>>, vector<4x128xf32>,
    } else {
    }
    %c0 = arith.constant 0 : index
    %c0_1 = arith.constant 0 : index
    %3 = vector.load %arg5[%c0, %c0_1] : memref<4x128xf32, #tpu.memory_space<vmem>>, vector<4x128xf32>
    %c0_2 = arith.constant 0 : index
    %c0_3 = arith.constant 0 : index
    %4 = vector.load %arg2[%c0_2, %c0_3] : memref<4x512xf32, #tpu.memory_space<vmem>>, vector<4x512xf32>
    %5 = arith.truncf %4 : vector<4x512xf32> to vector<4x512xbf16>
    %c0_4 = arith.constant 0 : index
    %c0_5 = arith.constant 0 : index
    %6 = vector.load %arg3[%c0_4, %c0_5] : memref<512x128xbf16, #tpu.memory_space<vmem>>, vector<512x128xbf16>
    %cst = arith.constant dense<0.000000e+00> : vector<4x128xf32>
    %7 = tpu.matmul %5, %6, %cst {dimension_numbers = #tpu.dot_dimension_numbers<[1], [0], [0], [1], [0, 0, 1, 1], [], []>} : vector<4x512xbf16>, vector<512x128xbf16>, vector<4x128xf32> -> vector<4x128xf32>
    %8 = arith.addf %3, %7 : vector<4x128xf32>
    %c0_6 = arith.constant 0 : index
    %c0_7 = arith.constant 0 : index
    %9 = vector.load %arg5[%c0_6, %c0_7] : memref<4x128xf32, #tpu.memory_space<vmem>>, vector<4x128xf32>
    tpu.vector_store %arg5[%c0_6, %c0_7], %8 {strides = array<i32>} : memref<4x128xf32, #tpu.memory_space<vmem>>, vector<4x128xf32>,
    return
  }
  func.func @transform_0(%arg0: i32, %arg1: i32) -> (i32, i32) {
    %c0_i32 = arith.constant 0 : i32
    return %arg0, %arg1 : i32, i32
  }
  func.func @transform_1(%arg0: i32, %arg1: i32) -> (i32, i32) {
    %c0_i32 = arith.constant 0 : i32
    %c0_i32_0 = arith.constant 0 : i32
    return %arg1, %c0_i32 : i32, i32
  }
  func.func @transform_2(%arg0: i32, %arg1: i32) -> (i32, i32) {
    %c0_i32 = arith.constant 0 : i32
    %c0_i32_0 = arith.constant 0 : i32
    %c0_i32_1 = arith.constant 0 : i32
    return %c0_i32, %c0_i32_0 : i32, i32
  }
  func.func @transform_3(%arg0: i32, %arg1: i32) -> (i32, i32) {
    %c0_i32 = arith.constant 0 : i32
    %c0_i32_0 = arith.constant 0 : i32
    return %arg0, %c0_i32 : i32, i32
  }
}

</mosaic_0001>

<bundles_post_ra>
// kernel: pallas_affine_forward.1
= control target key start
LH: loop header
LB: loop body
LE: loop exit
PB: predicated region body
PF: predicated region fallthrough
CT: control target
= control target key end

     0   :  { %8 = vsyncpa [#allocation3], 0  ;;  %s644_s0 = inlined_call_operand.vmem [shape: f32[4,512], index: 0, kind: input, shape index: {}]   ;;  %s645_s1 = inlined_call_operand.hbm [shape: bf16[512,128], index: 1, kind: input, shape index: {}]   ;;  %s646_s2 = inlined_call_operand.vmem [shape: f32[1,128], index: 2, kind: input, shape index: {}]   ;;  %s647_s3 = inlined_call_operand.hbm [shape: f32[4,128], index: 3, kind: output, shape index: {}]  }
   0x1   :  { %9 = vsyncpa [#allocation4], 0  ;;  %s16_s14 = sshll.u32 %s645_s1, 4  ;;  %s605_s15 = smov [#allocation2]   ;;  %s17_s14 = int_to_ptr.hbm [resolvable:$true] %s16_s14 }
   0x2   :  { %s18_s16 = sshll.u32 %s605_s15, 4  ;;  %s606_s17 = smov 64   ;;  %s19_s16 = int_to_ptr.vmem [resolvable:$true] %s18_s16 }
   0x3   :  { %s607_s18 = smov 4  }
   0x4   :  { %24 = dma.hbm_to_vmem [thread:$0]  %s17_s14, 4096, %s19_s16, [#allocation3], %s606_s17, %s606_s17, %s607_s18  }
   0x5   :  { %601 = dma.done.wait [#allocation3], 4096  }
   0x6   :  { %602 = vsyncadd [#allocation3], 4294963200  ;;  %v523_v0 = vld [vmem:[#allocation2 + $0x38] sm:$0xff]  ;;  %v522_v4 = vld [vmem:[#allocation2 + $0x30] sm:$0xff]  ;;  %s608_s23 = smov [#allocation5]   ;;  %s378_s27 = sshll.u32 %s647_s3, 4  ;;  %s379_s27 = int_to_ptr.hbm [resolvable:$true] %s378_s27 }
   0x7   :  { %v531_v1 = vld [vmem:[#allocation2 + $0x78] sm:$0xff]  ;;  %317 = vmatpush.bf16.msra.mxu0 %v523_v0  ;;  %v530_v5 = vld [vmem:[#allocation2 + $0x70] sm:$0xff]  ;;  %v521_v8 = vld [vmem:[#allocation2 + $0x28] sm:$0xff]  ;;  %s376_s24 = sshll.u32 %s608_s23, 4  ;;  %s377_s24 = int_to_ptr.vmem [resolvable:$true] %s376_s24 }
   0x8   :  { %v539_v2 = vld [vmem:[#allocation2 + $0xb8] sm:$0xff]  ;;  %330 = vmatpush.bf16.msra.mxu1 %v531_v1  ;;  %v538_v6 = vld [vmem:[#allocation2 + $0xb0] sm:$0xff]  ;;  %v529_v9 = vld [vmem:[#allocation2 + $0x68] sm:$0xff] }
   0x9   :  { %v547_v3 = vld [vmem:[#allocation2 + $0xf8] sm:$0xff]  ;;  %343 = vmatpush.bf16.msra.mxu2 %v539_v2  ;;  %v546_v7 = vld [vmem:[#allocation2 + $0xf0] sm:$0xff]  ;;  %v537_v10 = vld [vmem:[#allocation2 + $0xa8] sm:$0xff] }
   0xa   :  { %356 = vmatpush.bf16.msra.mxu3 %v547_v3  ;;  %v545_v11 = vld [vmem:[#allocation2 + $0xe8] sm:$0xff]  ;;  %v520_v12 = vld [vmem:[#allocation2 + $0x20] sm:$0xff]  ;;  %v42_v15 = vld [vmem:[%s644_s0] sm:$0xff] }
   0xb   :  { %318 = vmatpush.bf16.msra.mxu0 %v522_v4  ;;  %v528_v13 = vld [vmem:[#allocation2 + $0x60] sm:$0xff]  ;;  %46 = vst [vmem:[#allocation1] ss:$2 sm:$0xff] %v42_v15  ;;  %v519_v18 = vld [vmem:[#allocation2 + $0x18] sm:$0xff]  ;;  %v518_v22 = vld [vmem:[#allocation2 + $0x10] sm:$0xff] }
   0xc   :  { %331 = vmatpush.bf16.msra.mxu1 %v530_v5  ;;  %v536_v14 = vld [vmem:[#allocation2 + $0xa0] sm:$0xff]  ;;  %v527_v19 = vld [vmem:[#allocation2 + $0x58] sm:$0xff]  ;;  %v526_v23 = vld [vmem:[#allocation2 + $0x50] sm:$0xff] }
   0xd   :  { %344 = vmatpush.bf16.msra.mxu2 %v538_v6  ;;  %v544_v16 = vld [vmem:[#allocation2 + $0xe0] sm:$0xff]  ;;  %v535_v20 = vld [vmem:[#allocation2 + $0x98] sm:$0xff]  ;;  %v534_v24 = vld [vmem:[#allocation2 + $0x90] sm:$0xff] }
   0xe   :  { %357 = vmatpush.bf16.msra.mxu3 %v546_v7  ;;  %v43_v17 = vld [vmem:[%s644_s0 + $0x8] sm:$0xff]  ;;  %v543_v21 = vld [vmem:[#allocation2 + $0xd8] sm:$0xff]  ;;  %v542_v25 = vld [vmem:[#allocation2 + $0xd0] sm:$0xff] }
   0xf   :  { %319 = vmatpush.bf16.msra.mxu0 %v521_v8  ;;  %48 = vst [vmem:[#allocation1 + $0x10] ss:$2 sm:$0xff] %v43_v17  ;;  %v517_v26 = vld [vmem:[#allocation2 + $0x8] sm:$0xff]  ;;  %v516_v30 = vld [vmem:[#allocation2] sm:$0xff]  ;;  %v552_v42 = vld [vmem:[%s646_s2] ss:$0 sm:$0xff] }
  0x10   :  { %332 = vmatpush.bf16.msra.mxu1 %v529_v9  ;;  %v525_v27 = vld [vmem:[#allocation2 + $0x48] sm:$0xff]  ;;  %v524_v31 = vld [vmem:[#allocation2 + $0x40] sm:$0xff]  ;;  %40 = vst [vmem:[#allocation5] sm:$0xf] %v552_v42 }
  0x11   :  { %345 = vmatpush.bf16.msra.mxu2 %v537_v10  ;;  %v533_v28 = vld [vmem:[#allocation2 + $0x88] sm:$0xff]  ;;  %v532_v32 = vld [vmem:[#allocation2 + $0x80] sm:$0xff] }
  0x12   :  { %358 = vmatpush.bf16.msra.mxu3 %v545_v11  ;;  %v541_v29 = vld [vmem:[#allocation2 + $0xc8] sm:$0xff]  ;;  %v540_v33 = vld [vmem:[#allocation2 + $0xc0] sm:$0xff]  ;;  %v49_v34 = vld.sshfl [vmem:[#allocation1] sm:$0xff pattern:$0x75316420] }
  0x13   :  { %320 = vmatpush.bf16.msra.mxu0 %v520_v12  ;;  %v50_v35 = vld.sshfl [vmem:[#allocation1 + $0x8] sm:$0xff pattern:$0x75316420]  ;;  %v57_v38 = vpack.c.bf16 %v49_v34, %v49_v34 }
  0x14   :  { %333 = vmatpush.bf16.msra.mxu1 %v528_v13  ;;  %v58_v39 = vpack.c.bf16 %v50_v35, %v50_v35 }
  0x15   :  { %346 = vmatpush.bf16.msra.mxu2 %v536_v14 }
  0x16   :  { %359 = vmatpush.bf16.msra.mxu3 %v544_v16  ;;  %v51_v36 = vld.sshfl [vmem:[#allocation1 + $0x10] sm:$0xff pattern:$0x75316420]  ;;  %v52_v37 = vld.sshfl [vmem:[#allocation1 + $0x18] sm:$0xff pattern:$0x75316420] }
  0x17   :  { %321 = vmatpush.bf16.msra.mxu0 %v519_v18  ;;  %v59_v40 = vpack.c.bf16 %v51_v36, %v51_v36  ;;  %v60_v41 = vpack.c.bf16 %v52_v37, %v52_v37  ;;  %v41_v51 = vld [vmem:[#allocation5] sm:$0xf] }
  0x18   :  { %334 = vmatpush.bf16.msra.mxu1 %v527_v19 }
  0x19   :  { %347 = vmatpush.bf16.msra.mxu2 %v535_v20 }
  0x1a   :  { %360 = vmatpush.bf16.msra.mxu3 %v543_v21 }
  0x1b   :  { %322 = vmatpush.bf16.msra.mxu0 %v518_v22 }
  0x1c   :  { %335 = vmatpush.bf16.msra.mxu1 %v526_v23 }
  0x1d   :  { %348 = vmatpush.bf16.msra.mxu2 %v534_v24 }
  0x1e   :  { %361 = vmatpush.bf16.msra.mxu3 %v542_v25 }
  0x1f   :  { %323 = vmatpush.bf16.msra.mxu0 %v517_v26 }
  0x20   :  { %336 = vmatpush.bf16.msra.mxu1 %v525_v27 }
  0x21   :  { %349 = vmatpush.bf16.msra.mxu2 %v533_v28 }
  0x22   :  { %362 = vmatpush.bf16.msra.mxu3 %v541_v29 }
  0x23   :  { %324 = vmatpush.bf16.msra.mxu0 %v516_v30 }
  0x24   :  { %337 = vmatpush.bf16.msra.mxu1 %v524_v31 }
  0x25   :  { %350 = vmatpush.bf16.msra.mxu2 %v532_v32 }
  0x26   :  { %363 = vmatpush.bf16.msra.mxu3 %v540_v33  ;;  %325 = vmatmul.bf16.vlgmr.msra.gmra.mxu0 %v57_v38 }
  0x27   :  { %338 = vmatmul.bf16.vlgmr.msra.gmra.mxu1 %v58_v39 }
  0x28   :  { %351 = vmatmul.bf16.vlgmr.msra.gmra.mxu2 %v59_v40 }
  0x29   :  { %364 = vmatmul.bf16.vlgmr.msra.gmra.mxu3 %v60_v41 }
  0xa3   :  { %v326_v43 = vpop.f32.mrf.mxu0 }
  0xa4   :  { %v339_v44 = vpop.f32.mrf.mxu1 }
  0xa5   :  { %v340_v45 = vadd.f32 %v339_v44, %v326_v43 }
  0xab   :  { %v352_v46 = vpop.f32.mrf.mxu2  ;;  %v328_v49 = vpop.f32.mrf.mxu0 }
  0xac   :  { %v365_v47 = vpop.f32.mrf.mxu3  ;;  %v353_v48 = vadd.f32 %v352_v46, %v340_v45  ;;  %v341_v50 = vpop.f32.mrf.mxu1 }
  0xae   :  { %v366_v52 = vadd.f32 %v365_v47, %v353_v48 }
  0xb0   :  { %v369_v53 = vadd.f32 %v366_v52, %v41_v51 }
  0xb2   :  { %370 = vst [vmem:[#allocation5] sm:$0xf] %v369_v53 }
  0xb3   :  { %v354_v54 = vpop.f32.mrf.mxu2  ;;  %381 = dma.vmem_to_hbm [thread:$0]  %s377_s24, 64, %s379_s27, [#allocation4]  }
  0xb4   :  { %v367_v55 = vpop.f32.mrf.mxu3 }
  0xb5   :  { %603 = dma.done.wait [#allocation4], 64  }
  0xb6   :  { %604 = vsyncadd [#allocation4], 4294967232 }
  0xb7   :  { %386 = vsyncpa [#allocation3], 1 }
  0xb8   :  { %387 = vsyncpa [#allocation4], 1 }

</bundles_post_ra>
